<compile_context>
chip_gen: v6e
topology: v6e:2x2x1
jax: 0.10.0
libtpu: 0.0.40
codegen_flags: <defaults>
</compile_context>

<pallas_src>
import math
import jax
import jax.numpy as jnp
from jax.experimental import pallas as pl
from jax.experimental.pallas import tpu as pltpu


def extraction_kernel(x_ref, wq_ref, wk_ref, wv_ref, wo_ref,
                      w1_ref, b1_ref, w2_ref, b2_ref, out_ref):
    TB, N, H = x_ref.shape
    cdt = x_ref.dtype                      # compute dtype for MXU operands
    scale = 1.0 / math.sqrt(H)             # n_heads=1 -> head_dim == H

    x = x_ref[...]                         # (TB, N, H)
    xf = x.reshape(TB * N, H)              # tall slab for the big matmuls

    # --- single-head attention: projections on the flattened slab ---
    q = jnp.dot(xf, wq_ref[...], preferred_element_type=jnp.float32)
    k = jnp.dot(xf, wk_ref[...], preferred_element_type=jnp.float32)
    v = jnp.dot(xf, wv_ref[...], preferred_element_type=jnp.float32)

    qb = (q * scale).astype(cdt).reshape(TB, N, H)
    kb = k.astype(cdt).reshape(TB, N, H)
    vb = v.astype(cdt).reshape(TB, N, H)

    # scores: contract last dims (no explicit k.T / XLU transpose)
    s = jnp.einsum("bnd,bmd->bnm", qb, kb,
                   preferred_element_type=jnp.float32)            # (TB, N, N)
    s = s - jnp.max(s, axis=-1, keepdims=True)                    # f32 softmax
    p = jnp.exp(s)
    p = p * pl.reciprocal(jnp.sum(p, axis=-1, keepdims=True), approx=True)

    attn = jnp.einsum("bnm,bmd->bnd", p.astype(cdt), vb,
                      preferred_element_type=jnp.float32)         # (TB, N, H)
    attn_f = attn.reshape(TB * N, H).astype(cdt)
    attn_out = jnp.dot(attn_f, wo_ref[...],
                       preferred_element_type=jnp.float32)        # (TB*N, H)

    # --- MLP on implicit concat [x, attn_out]: split w1 (no concatenate) ---
    w1x = w1_ref[pl.ds(0, H), :]           # rows for the x half (concat order)
    w1a = w1_ref[pl.ds(H, H), :]           # rows for the attn_out half
    h1 = (jnp.dot(xf, w1x, preferred_element_type=jnp.float32)
          + jnp.dot(attn_out.astype(cdt), w1a,
                    preferred_element_type=jnp.float32)
          + b1_ref[...])                                          # f32
    h1 = jnp.maximum(h1, 0.0)
    y = (jnp.dot(h1.astype(cdt), w2_ref[...],
                 preferred_element_type=jnp.float32)
         + b2_ref[...])

    out_ref[...] = y.reshape(TB, N, H).astype(out_ref.dtype)


def extraction_module(x, params, *, block_b=None, compute_dtype=jnp.bfloat16):
    """x: (B, N, H) float32. params: dict of weights (see init_params)."""
    B, N, H = x.shape
    out_dtype = x.dtype

    # Batch-tile so each grid step feeds the MXU ~128 rows (TB*N >= 128 when
    # the batch is large enough); pad B to a multiple of TB with zeros.
    if block_b is None:
        block_b = max(1, min(B, pl.cdiv(128, N)))
    TB = int(block_b)
    num_blocks = pl.cdiv(B, TB)
    Bp = num_blocks * TB

    cdt = compute_dtype
    x_in = x.astype(cdt)
    if Bp != B:
        x_in = jnp.pad(x_in, ((0, Bp - B), (0, 0), (0, 0)))

    # MXU operands in compute dtype; biases stay f32 (added to f32 accumulators).
    wq = params["wq"].astype(cdt)
    wk = params["wk"].astype(cdt)
    wv = params["wv"].astype(cdt)
    wo = params["wo"].astype(cdt)
    w1 = params["w1"].astype(cdt)
    w2 = params["w2"].astype(cdt)
    b1 = params["b1"].astype(jnp.float32)
    b2 = params["b2"].astype(jnp.float32)

    def full(shape):
        return pl.BlockSpec(shape, lambda b, _n=len(shape): (0,) * _n)

    out = pl.pallas_call(
        extraction_kernel,
        out_shape=jax.ShapeDtypeStruct((Bp, N, H), out_dtype),
        grid_spec=pltpu.PrefetchScalarGridSpec(
            num_scalar_prefetch=0,
            grid=(num_blocks,),
            in_specs=[
                pl.BlockSpec((TB, N, H), lambda b: (b, 0, 0)),   # x
                full((H, H)),        # wq
                full((H, H)),        # wk
                full((H, H)),        # wv
                full((H, H)),        # wo
                full((2 * H, H)),    # w1 (rows [0:H]=x half, [H:2H]=attn half)
                full((1, H)),        # b1
                full((H, H)),        # w2
                full((1, H)),        # b2
            ],
            out_specs=pl.BlockSpec((TB, N, H), lambda b: (b, 0, 0)),
        ),
        compiler_params=pltpu.CompilerParams(
            dimension_semantics=("parallel",)),
    )(x_in, wq, wk, wv, wo, w1, b1, w2, b2)

    if Bp != B:
        out = out[:B]
    return out


def init_params(key, hidden_dim):
    """Deterministic synthetic parameter init (shapes from the module __init__).

    Weights are stored as (in_features, out_features) so the kernel computes
    x @ W (equivalent to PyTorch's x @ W_torch.T)."""
    H = hidden_dim
    ks = jax.random.split(key, 8)
    u = lambda k, shape, bound: jax.random.uniform(
        k, shape, jnp.float32, minval=-bound, maxval=bound)
    std_attn = 1.0 / math.sqrt(H)
    std_l1 = 1.0 / math.sqrt(2 * H)
    std_l2 = 1.0 / math.sqrt(H)
    return {
        "wq": u(ks[0], (H, H), std_attn),
        "wk": u(ks[1], (H, H), std_attn),
        "wv": u(ks[2], (H, H), std_attn),
        "wo": u(ks[3], (H, H), std_attn),
        "w1": u(ks[4], (2 * H, H), std_l1),
        "b1": u(ks[5], (1, H), std_l1),
        "w2": u(ks[6], (H, H), std_l2),
        "b2": u(ks[7], (1, H), std_l2),
    }


def reference(x, p):
    """Pure-JAX f32 reference for verification."""
    H = x.shape[-1]
    q = x @ p["wq"]; k = x @ p["wk"]; v = x @ p["wv"]
    s = jnp.einsum("bnd,bmd->bnm", q, k) / math.sqrt(H)
    a = jax.nn.softmax(s, axis=-1)
    attn_out = jnp.einsum("bnm,bmd->bnd", a, v) @ p["wo"]
    cat = jnp.concatenate([x, attn_out], axis=-1)
    h1 = jnp.maximum(cat @ p["w1"] + p["b1"][0], 0.0)
    return h1 @ p["w2"] + p["b2"][0]


if __name__ == "__main__":
    B, N, H = 2, 8, 128  # batch, n_agents, hidden_dim (module default H=128)
    key = jax.random.PRNGKey(0)
    kx, kp, kx2 = jax.random.split(key, 3)
    x = jax.random.normal(kx, (B, N, H), dtype=jnp.float32)
    params = init_params(kp, H)
    ref = reference(x, params)

    # Exact-path check (f32 matmul operands).
    out_f32 = jax.block_until_ready(
        extraction_module(x, params, compute_dtype=jnp.float32))
    assert out_f32.shape == (B, N, H)
    err = jnp.max(jnp.abs(out_f32 - ref))
    assert jnp.allclose(out_f32, ref, atol=2e-3, rtol=2e-3), (
        f"f32 path max abs err = {err}")

    # Fast path (default): bf16 MXU operands, f32 accumulation / softmax.
    out_bf16 = jax.block_until_ready(extraction_module(x, params))
    assert out_bf16.shape == (B, N, H)
    err = jnp.max(jnp.abs(out_bf16 - ref))
    assert jnp.allclose(out_bf16, ref, atol=3e-2, rtol=3e-2), (
        f"bf16 path max abs err = {err}")

    # Multi-step grid + batch-padding path (B=6 with TB=4 -> pad to 8, grid=2).
    B2 = 6
    x2 = jax.random.normal(kx2, (B2, N, H), dtype=jnp.float32)
    ref2 = reference(x2, params)
    out2 = jax.block_until_ready(extraction_module(x2, params, block_b=4))
    assert out2.shape == (B2, N, H)
    err2 = jnp.max(jnp.abs(out2 - ref2))
    assert jnp.allclose(out2, ref2, atol=3e-2, rtol=3e-2), (
        f"padded path max abs err = {err2}")

    print("KERNEL_OK")
</pallas_src>

<mosaic_0001>
module attributes {stable_mosaic.version = 11 : i64} {
  func.func @extraction_kernel(%arg0: i32, %arg1: memref<2x8x128xf32, #tpu.memory_space<vmem>>, %arg2: memref<128x128xf32, #tpu.memory_space<vmem>>, %arg3: memref<128x128xf32, #tpu.memory_space<vmem>>, %arg4: memref<128x128xf32, #tpu.memory_space<vmem>>, %arg5: memref<128x128xf32, #tpu.memory_space<vmem>>, %arg6: memref<256x128xf32, #tpu.memory_space<vmem>>, %arg7: memref<1x128xf32, #tpu.memory_space<vmem>>, %arg8: memref<128x128xf32, #tpu.memory_space<vmem>>, %arg9: memref<1x128xf32, #tpu.memory_space<vmem>>, %arg10: memref<2x8x128xf32, #tpu.memory_space<vmem>>) attributes {dimension_semantics = [#tpu.dimension_semantics<parallel>], iteration_bounds = array<i64: 1>, scalar_prefetch = 0 : i64, scratch_operands = 0 : i64, tpu.core_type = #tpu.core_type<tc>, window_params = [{transform_indices = @transform_0, window_bounds = array<i64: 2, 8, 128>}, {pipeline_mode = #tpu.pipeline_mode<synchronous>, transform_indices = @transform_1, window_bounds = array<i64: 128, 128>}, {pipeline_mode = #tpu.pipeline_mode<synchronous>, transform_indices = @transform_2, window_bounds = array<i64: 128, 128>}, {pipeline_mode = #tpu.pipeline_mode<synchronous>, transform_indices = @transform_3, window_bounds = array<i64: 128, 128>}, {pipeline_mode = #tpu.pipeline_mode<synchronous>, transform_indices = @transform_4, window_bounds = array<i64: 128, 128>}, {pipeline_mode = #tpu.pipeline_mode<synchronous>, transform_indices = @transform_5, window_bounds = array<i64: 256, 128>}, {pipeline_mode = #tpu.pipeline_mode<synchronous>, transform_indices = @transform_6, window_bounds = array<i64: 1, 128>}, {pipeline_mode = #tpu.pipeline_mode<synchronous>, transform_indices = @transform_7, window_bounds = array<i64: 128, 128>}, {pipeline_mode = #tpu.pipeline_mode<synchronous>, transform_indices = @transform_8, window_bounds = array<i64: 1, 128>}, {transform_indices = @transform_9, window_bounds = array<i64: 2, 8, 128>}]} {
    %c0 = arith.constant 0 : index
    %c0_0 = arith.constant 0 : index
    %c0_1 = arith.constant 0 : index
    %0 = vector.load %arg1[%c0, %c0_0, %c0_1] : memref<2x8x128xf32, #tpu.memory_space<vmem>>, vector<2x8x128xf32>
    %1 = vector.shape_cast %0 : vector<2x8x128xf32> to vector<16x128xf32>
    %c0_2 = arith.constant 0 : index
    %c0_3 = arith.constant 0 : index
    %2 = vector.load %arg2[%c0_2, %c0_3] : memref<128x128xf32, #tpu.memory_space<vmem>>, vector<128x128xf32>
    %cst = arith.constant dense<0.000000e+00> : vector<16x128xf32>
    %3 = tpu.matmul %1, %2, %cst {dimension_numbers = #tpu.dot_dimension_numbers<[1], [0], [0], [1], [0, 0, 1, 1], [], []>} : vector<16x128xf32>, vector<128x128xf32>, vector<16x128xf32> -> vector<16x128xf32>
    %c0_4 = arith.constant 0 : index
    %c0_5 = arith.constant 0 : index
    %4 = vector.load %arg3[%c0_4, %c0_5] : memref<128x128xf32, #tpu.memory_space<vmem>>, vector<128x128xf32>
    %cst_6 = arith.constant dense<0.000000e+00> : vector<16x128xf32>
    %5 = tpu.matmul %1, %4, %cst_6 {dimension_numbers = #tpu.dot_dimension_numbers<[1], [0], [0], [1], [0, 0, 1, 1], [], []>} : vector<16x128xf32>, vector<128x128xf32>, vector<16x128xf32> -> vector<16x128xf32>
    %c0_7 = arith.constant 0 : index
    %c0_8 = arith.constant 0 : index
    %6 = vector.load %arg4[%c0_7, %c0_8] : memref<128x128xf32, #tpu.memory_space<vmem>>, vector<128x128xf32>
    %cst_9 = arith.constant dense<0.000000e+00> : vector<16x128xf32>
    %7 = tpu.matmul %1, %6, %cst_9 {dimension_numbers = #tpu.dot_dimension_numbers<[1], [0], [0], [1], [0, 0, 1, 1], [], []>} : vector<16x128xf32>, vector<128x128xf32>, vector<16x128xf32> -> vector<16x128xf32>
    %cst_10 = arith.constant 0.0883883461 : f32
    %8 = vector.broadcast %cst_10 : f32 to vector<16x128xf32>
    %9 = arith.mulf %3, %8 : vector<16x128xf32>
    %10 = vector.shape_cast %9 : vector<16x128xf32> to vector<2x8x128xf32>
    %11 = vector.shape_cast %5 : vector<16x128xf32> to vector<2x8x128xf32>
    %12 = vector.shape_cast %7 : vector<16x128xf32> to vector<2x8x128xf32>
    "tpu.trace_start"() <{level = 10 : i32, message = "bnd,bmd->bnm"}> : () -> ()
    %cst_11 = arith.constant dense<0.000000e+00> : vector<2x8x8xf32>
    %13 = tpu.matmul %10, %11, %cst_11 {dimension_numbers = #tpu.dot_dimension_numbers<[2], [2], [1], [1], [0, 0, 0, 1, 1, 1], [0], [0]>} : vector<2x8x128xf32>, vector<2x8x128xf32>, vector<2x8x8xf32> -> vector<2x8x8xf32>
    "tpu.trace_stop"() : () -> ()
    %cst_12 = arith.constant dense<0xFF800000> : vector<2x8xf32>
    %14 = vector.multi_reduction <maximumf>, %13, %cst_12 [2] : vector<2x8x8xf32> to vector<2x8xf32>
    %15 = vector.shape_cast %14 : vector<2x8xf32> to vector<2x8x1xf32>
    %16 = vector.broadcast %15 : vector<2x8x1xf32> to vector<2x8x8xf32>
    %17 = arith.subf %13, %16 : vector<2x8x8xf32>
    %18 = math.exp %17 : vector<2x8x8xf32>
    %cst_13 = arith.constant dense<0.000000e+00> : vector<2x8xf32>
    %19 = vector.multi_reduction <add>, %18, %cst_13 [2] : vector<2x8x8xf32> to vector<2x8xf32>
    %20 = vector.shape_cast %19 : vector<2x8xf32> to vector<2x8x1xf32>
    %21 = tpu.reciprocal %20 {approx = true} : vector<2x8x1xf32> -> vector<2x8x1xf32>
    %22 = vector.broadcast %21 : vector<2x8x1xf32> to vector<2x8x8xf32>
    %23 = arith.mulf %18, %22 : vector<2x8x8xf32>
    "tpu.trace_start"() <{level = 10 : i32, message = "bnm,bmd->bnd"}> : () -> ()
    %cst_14 = arith.constant dense<0.000000e+00> : vector<2x8x128xf32>
    %24 = tpu.matmul %23, %12, %cst_14 {dimension_numbers = #tpu.dot_dimension_numbers<[2], [1], [1], [2], [0, 0, 0, 1, 1, 2], [0], [0]>} : vector<2x8x8xf32>, vector<2x8x128xf32>, vector<2x8x128xf32> -> vector<2x8x128xf32>
    "tpu.trace_stop"() : () -> ()
    %25 = vector.shape_cast %24 : vector<2x8x128xf32> to vector<16x128xf32>
    %c0_15 = arith.constant 0 : index
    %c0_16 = arith.constant 0 : index
    %26 = vector.load %arg5[%c0_15, %c0_16] : memref<128x128xf32, #tpu.memory_space<vmem>>, vector<128x128xf32>
    %cst_17 = arith.constant dense<0.000000e+00> : vector<16x128xf32>
    %27 = tpu.matmul %25, %26, %cst_17 {dimension_numbers = #tpu.dot_dimension_numbers<[1], [0], [0], [1], [0, 0, 1, 1], [], []>} : vector<16x128xf32>, vector<128x128xf32>, vector<16x128xf32> -> vector<16x128xf32>
    %c0_18 = arith.constant 0 : index
    %c0_19 = arith.constant 0 : index
    %28 = vector.load %arg6[%c0_18, %c0_19] : memref<256x128xf32, #tpu.memory_space<vmem>>, vector<128x128xf32>
    %c128 = arith.constant 128 : index
    %c0_20 = arith.constant 0 : index
    %29 = vector.load %arg6[%c128, %c0_20] : memref<256x128xf32, #tpu.memory_space<vmem>>, vector<128x128xf32>
    %cst_21 = arith.constant dense<0.000000e+00> : vector<16x128xf32>
    %30 = tpu.matmul %1, %28, %cst_21 {dimension_numbers = #tpu.dot_dimension_numbers<[1], [0], [0], [1], [0, 0, 1, 1], [], []>} : vector<16x128xf32>, vector<128x128xf32>, vector<16x128xf32> -> vector<16x128xf32>
    %cst_22 = arith.constant dense<0.000000e+00> : vector<16x128xf32>
    %31 = tpu.matmul %27, %29, %cst_22 {dimension_numbers = #tpu.dot_dimension_numbers<[1], [0], [0], [1], [0, 0, 1, 1], [], []>} : vector<16x128xf32>, vector<128x128xf32>, vector<16x128xf32> -> vector<16x128xf32>
    %32 = arith.addf %30, %31 : vector<16x128xf32>
    %c0_23 = arith.constant 0 : index
    %c0_24 = arith.constant 0 : index
    %33 = vector.load %arg7[%c0_23, %c0_24] : memref<1x128xf32, #tpu.memory_space<vmem>>, vector<1x128xf32>
    %34 = vector.broadcast %33 : vector<1x128xf32> to vector<16x128xf32>
    %35 = arith.addf %32, %34 : vector<16x128xf32>
    %cst_25 = arith.constant 0.000000e+00 : f32
    %36 = vector.broadcast %cst_25 : f32 to vector<16x128xf32>
    %37 = arith.maximumf %35, %36 : vector<16x128xf32>
    %c0_26 = arith.constant 0 : index
    %c0_27 = arith.constant 0 : index
    %38 = vector.load %arg8[%c0_26, %c0_27] : memref<128x128xf32, #tpu.memory_space<vmem>>, vector<128x128xf32>
    %cst_28 = arith.constant dense<0.000000e+00> : vector<16x128xf32>
    %39 = tpu.matmul %37, %38, %cst_28 {dimension_numbers = #tpu.dot_dimension_numbers<[1], [0], [0], [1], [0, 0, 1, 1], [], []>} : vector<16x128xf32>, vector<128x128xf32>, vector<16x128xf32> -> vector<16x128xf32>
    %c0_29 = arith.constant 0 : index
    %c0_30 = arith.constant 0 : index
    %40 = vector.load %arg9[%c0_29, %c0_30] : memref<1x128xf32, #tpu.memory_space<vmem>>, vector<1x128xf32>
    %41 = vector.broadcast %40 : vector<1x128xf32> to vector<16x128xf32>
    %42 = arith.addf %39, %41 : vector<16x128xf32>
    %43 = vector.shape_cast %42 : vector<16x128xf32> to vector<2x8x128xf32>
    %c0_31 = arith.constant 0 : index
    %c0_32 = arith.constant 0 : index
    %c0_33 = arith.constant 0 : index
    %44 = vector.load %arg10[%c0_31, %c0_32, %c0_33] : memref<2x8x128xf32, #tpu.memory_space<vmem>>, vector<2x8x128xf32>
    tpu.vector_store %arg10[%c0_31, %c0_32, %c0_33], %43 {strides = array<i32>} : memref<2x8x128xf32, #tpu.memory_space<vmem>>, vector<2x8x128xf32>,
    return
  }
  func.func @transform_0(%arg0: i32) -> (i32, i32, i32) {
    %c0_i32 = arith.constant 0 : i32
    %c0_i32_0 = arith.constant 0 : i32
    %c0_i32_1 = arith.constant 0 : i32
    return %arg0, %c0_i32, %c0_i32_0 : i32, i32, i32
  }
  func.func @transform_1(%arg0: i32) -> (i32, i32) {
    %c0_i32 = arith.constant 0 : i32
    %c0_i32_0 = arith.constant 0 : i32
    %c0_i32_1 = arith.constant 0 : i32
    return %c0_i32, %c0_i32_0 : i32, i32
  }
  func.func @transform_2(%arg0: i32) -> (i32, i32) {
    %c0_i32 = arith.constant 0 : i32
    %c0_i32_0 = arith.constant 0 : i32
    %c0_i32_1 = arith.constant 0 : i32
    return %c0_i32, %c0_i32_0 : i32, i32
  }
  func.func @transform_3(%arg0: i32) -> (i32, i32) {
    %c0_i32 = arith.constant 0 : i32
    %c0_i32_0 = arith.constant 0 : i32
    %c0_i32_1 = arith.constant 0 : i32
    return %c0_i32, %c0_i32_0 : i32, i32
  }
  func.func @transform_4(%arg0: i32) -> (i32, i32) {
    %c0_i32 = arith.constant 0 : i32
    %c0_i32_0 = arith.constant 0 : i32
    %c0_i32_1 = arith.constant 0 : i32
    return %c0_i32, %c0_i32_0 : i32, i32
  }
  func.func @transform_5(%arg0: i32) -> (i32, i32) {
    %c0_i32 = arith.constant 0 : i32
    %c0_i32_0 = arith.constant 0 : i32
    %c0_i32_1 = arith.constant 0 : i32
    return %c0_i32, %c0_i32_0 : i32, i32
  }
  func.func @transform_6(%arg0: i32) -> (i32, i32) {
    %c0_i32 = arith.constant 0 : i32
    %c0_i32_0 = arith.constant 0 : i32
    %c0_i32_1 = arith.constant 0 : i32
    return %c0_i32, %c0_i32_0 : i32, i32
  }
  func.func @transform_7(%arg0: i32) -> (i32, i32) {
    %c0_i32 = arith.constant 0 : i32
    %c0_i32_0 = arith.constant 0 : i32
    %c0_i32_1 = arith.constant 0 : i32
    return %c0_i32, %c0_i32_0 : i32, i32
  }
  func.func @transform_8(%arg0: i32) -> (i32, i32) {
    %c0_i32 = arith.constant 0 : i32
    %c0_i32_0 = arith.constant 0 : i32
    %c0_i32_1 = arith.constant 0 : i32
    return %c0_i32, %c0_i32_0 : i32, i32
  }
  func.func @transform_9(%arg0: i32) -> (i32, i32, i32) {
    %c0_i32 = arith.constant 0 : i32
    %c0_i32_0 = arith.constant 0 : i32
    %c0_i32_1 = arith.constant 0 : i32
    return %arg0, %c0_i32, %c0_i32_0 : i32, i32, i32
  }
}

</mosaic_0001>

<bundles_post_ra>
// kernel: tpu_custom_call.1
= control target key start
LH: loop header
LB: loop body
LE: loop exit
PB: predicated region body
PF: predicated region fallthrough
CT: control target
= control target key end

     0   :  { %14 = vsyncpa [#allocation3], 0  ;;  %s1857_s0 = inlined_call_operand.hbm [shape: f32[2,8,128], index: 0, kind: input, shape index: {}]   ;;  %s1858_s1 = inlined_call_operand.hbm [shape: f32[128,128], index: 1, kind: input, shape index: {}]   ;;  %s1859_s2 = inlined_call_operand.hbm [shape: f32[128,128], index: 2, kind: input, shape index: {}]   ;;  %s1860_s3 = inlined_call_operand.hbm [shape: f32[128,128], index: 3, kind: input, shape index: {}]   ;;  %s1861_s4 = inlined_call_operand.hbm [shape: f32[128,128], index: 4, kind: input, shape index: {}]   ;;  %s1862_s5 = inlined_call_operand.hbm [shape: f32[256,128], index: 5, kind: input, shape index: {}]   ;;  %s1863_s6 = inlined_call_operand.vmem [shape: f32[1,128], index: 6, kind: input, shape index: {}]   ;;  %s1864_s7 = inlined_call_operand.hbm [shape: f32[128,128], index: 7, kind: input, shape index: {}]   ;;  %s1865_s8 = inlined_call_operand.vmem [shape: f32[1,128], index: 8, kind: input, shape index: {}]   ;;  %s1866_s9 = inlined_call_operand.hbm [shape: f32[2,8,128], index: 9, kind: output, shape index: {}]  }
   0x1   :  { %15 = vsyncpa [#allocation6], 0 }
   0x2   :  { %16 = vsyncpa [#allocation9], 0 }
   0x3   :  { %17 = vsyncpa [#allocation12], 0 }
   0x4   :  { %18 = vsyncpa [#allocation4], 0  ;;  %s1711_s30 = smov [#allocation5]   ;;  %s1712_s11 = smov [#allocation8]  }
   0x5   :  { %s36_s10 = sshll.u32 %s1711_s30, 4  ;;  %s60_s12 = sshll.u32 %s1712_s11, 4  ;;  %s37_s10 = int_to_ptr.vmem [resolvable:$true] %s36_s10  ;;  %s61_s12 = int_to_ptr.vmem [resolvable:$true] %s60_s12 }
   0x6   :  { %s1549_s13 = scalar_lea.vmem %s37_s10, 2048  ;;  %p1554_p1 = scmp.lt.s32.totalorder %s37_s10, %s37_s10 }
   0x7   :  { %p1550_p0 = scmp.ne.s32.totalorder %s37_s10, %s1549_s13  ;;  %p1555_p2 = scmp.lt.s32.totalorder %s1549_s13, %s1549_s13 }
   0x9   :  { %p1556_p3 = por %p1555_p2, %p1554_p1 }
   0xb   :  { %p1557_p4 = pnand %p1556_p3, %p1550_p0 }
   0xd   :  { %1560 = shalt.err (!%p1557_p4)
}
   0xe   :  { %s1713_s14 = smov 128   ;;  %s1714_s15 = smov 8  }
   0xf   :  { %42 = dma.hbm_to_vmem [thread:$0]  %s1858_s1, 2048, %s37_s10, [#allocation6], %s1713_s14, %s1713_s14, %s1714_s15  }
  0x10   :  { %s1569_s18 = scalar_lea.vmem %s61_s12, 2048  ;;  %p1574_p6 = scmp.lt.s32.totalorder %s61_s12, %s61_s12 }
  0x11   :  { %p1570_p5 = scmp.ne.s32.totalorder %s61_s12, %s1569_s18  ;;  %p1575_p7 = scmp.lt.s32.totalorder %s1569_s18, %s1569_s18 }
  0x13   :  { %p1576_p8 = por %p1575_p7, %p1574_p6 }
  0x15   :  { %p1577_p9 = pnand %p1576_p8, %p1570_p5 }
  0x17   :  { %1580 = shalt.err (!%p1577_p9)
}
  0x18   :  { %66 = dma.hbm_to_vmem [thread:$0]  %s1860_s3, 2048, %s61_s12, [#allocation9], %s1713_s14, %s1713_s14, %s1714_s15  }
  0x19   :  { %s1715_s21 = smov [#allocation11]   ;;  %s1716_s23 = smov [#allocation2]  }
  0x1a   :  { %s84_s22 = sshll.u32 %s1715_s21, 4  ;;  %s24_s24 = sshll.u32 %s1716_s23, 4  ;;  %s85_s22 = int_to_ptr.vmem [resolvable:$true] %s84_s22  ;;  %s25_s24 = int_to_ptr.vmem [resolvable:$true] %s24_s24 }
  0x1b   :  { %s1589_s1 = scalar_lea.vmem %s85_s22, 4096  ;;  %p1594_p11 = scmp.lt.s32.totalorder %s85_s22, %s85_s22 }
  0x1c   :  { %p1590_p10 = scmp.ne.s32.totalorder %s85_s22, %s1589_s1  ;;  %p1595_p12 = scmp.lt.s32.totalorder %s1589_s1, %s1589_s1 }
  0x1e   :  { %p1596_p13 = por %p1595_p12, %p1594_p11 }
  0x20   :  { %p1597_p0 = pnand %p1596_p13, %p1590_p10 }
  0x22   :  { %1600 = shalt.err (!%p1597_p0)
}
  0x23   :  { %90 = dma.hbm_to_vmem [thread:$0]  %s1862_s5, 4096, %s85_s22, [#allocation12], %s1713_s14, %s1713_s14, %s1714_s15  }
  0x24   :  { %s1609_s3 = scalar_lea.vmem %s25_s24, 256  ;;  %p1614_p2 = scmp.lt.s32.totalorder %s25_s24, %s25_s24 }
  0x25   :  { %p1610_p1 = scmp.ne.s32.totalorder %s25_s24, %s1609_s3  ;;  %p1615_p3 = scmp.lt.s32.totalorder %s1609_s3, %s1609_s3 }
  0x27   :  { %p1616_p4 = por %p1615_p3, %p1614_p2 }
  0x29   :  { %p1617_p5 = pnand %p1616_p4, %p1610_p1 }
  0x2b   :  { %1620 = shalt.err (!%p1617_p5)
}
  0x2c   :  { %30 = dma.hbm_to_vmem [thread:$0]  %s1857_s0, 256, %s25_s24, [#allocation3], %s1713_s14, %s1713_s14, %s1714_s15  }
  0x2d   :  { %s1717_s29 = smov [#allocation7]   ;;  %s1718_s10 = smov [#allocation10]  }
  0x2e   :  { %s48_s30 = sshll.u32 %s1717_s29, 4  ;;  %s72_s11 = sshll.u32 %s1718_s10, 4  ;;  %s49_s30 = int_to_ptr.vmem [resolvable:$true] %s48_s30  ;;  %s73_s11 = int_to_ptr.vmem [resolvable:$true] %s72_s11 }
  0x2f   :  { %s1629_s5 = scalar_lea.vmem %s49_s30, 2048  ;;  %p1634_p7 = scmp.lt.s32.totalorder %s49_s30, %s49_s30 }
  0x30   :  { %p1630_p6 = scmp.ne.s32.totalorder %s49_s30, %s1629_s5  ;;  %p1635_p8 = scmp.lt.s32.totalorder %s1629_s5, %s1629_s5 }
  0x32   :  { %p1636_p9 = por %p1635_p8, %p1634_p7 }
  0x34   :  { %p1637_p10 = pnand %p1636_p9, %p1630_p6 }
  0x36   :  { %1640 = shalt.err (!%p1637_p10)
}
  0x37   :  { %54 = dma.hbm_to_vmem [thread:$0]  %s1859_s2, 2048, %s49_s30, [#allocation6], %s1713_s14, %s1713_s14, %s1714_s15  }
  0x38   :  { %s1649_s0 = scalar_lea.vmem %s73_s11, 2048  ;;  %p1654_p12 = scmp.lt.s32.totalorder %s73_s11, %s73_s11 }
  0x39   :  { %p1650_p11 = scmp.ne.s32.totalorder %s73_s11, %s1649_s0  ;;  %p1655_p13 = scmp.lt.s32.totalorder %s1649_s0, %s1649_s0 }
  0x3b   :  { %p1656_p0 = por %p1655_p13, %p1654_p12 }
  0x3d   :  { %p1657_p1 = pnand %p1656_p0, %p1650_p11 }
  0x3f   :  { %1660 = shalt.err (!%p1657_p1)
}
  0x40   :  { %78 = dma.hbm_to_vmem [thread:$0]  %s1861_s4, 2048, %s73_s11, [#allocation9], %s1713_s14, %s1713_s14, %s1714_s15  }
  0x41   :  { %s1719_s18 = smov [#allocation13]  }
  0x42   :  { %s98_s19 = sshll.u32 %s1719_s18, 4  ;;  %s99_s19 = int_to_ptr.vmem [resolvable:$true] %s98_s19 }
  0x43   :  { %s1669_s20 = scalar_lea.vmem %s99_s19, 2048  ;;  %p1674_p3 = scmp.lt.s32.totalorder %s99_s19, %s99_s19 }
  0x44   :  { %p1670_p2 = scmp.ne.s32.totalorder %s99_s19, %s1669_s20  ;;  %p1675_p4 = scmp.lt.s32.totalorder %s1669_s20, %s1669_s20 }
  0x46   :  { %p1676_p5 = por %p1675_p4, %p1674_p3 }
  0x48   :  { %p1677_p6 = pnand %p1676_p5, %p1670_p2 }
  0x4a   :  { %1680 = shalt.err (!%p1677_p6)
}
  0x4b   :  { %104 = dma.hbm_to_vmem [thread:$0]  %s1864_s7, 2048, %s99_s19, [#allocation12], %s1713_s14, %s1713_s14, %s1714_s15  }
  0x4c   :  { %1701 = dma.done.wait [#allocation3], 256  }
  0x4d   :  { %1702 = vsyncadd [#allocation3], 4294967040 }
  0x4e   :  { %1703 = dma.done.wait [#allocation6], 4096  }
  0x4f   :  { %1704 = vsyncadd [#allocation6], 4294963200 }
  0x50   :  { %1705 = dma.done.wait [#allocation9], 4096  }
  0x51   :  { %1706 = vsyncadd [#allocation9], 4294963200 }
  0x52   :  { %1707 = dma.done.wait [#allocation12], 6144  }
  0x53   :  { %1708 = vsyncadd [#allocation12], 4294961152  ;;  %v145_v0 = vld [vmem:[#allocation5 + $0x78] sm:$0xff]  ;;  %v144_v2 = vld [vmem:[#allocation5 + $0x70] sm:$0xff]  ;;  %v1720_v34 = vmov 0.0   ;;  %vm1721_vm0 = vmmov 0  }
  0x54   :  { %v236_v1 = vld [vmem:[#allocation7 + $0x78] sm:$0xff]  ;;  %1256 = vmatprep.subr.mxu0 %v145_v0  ;;  %v235_v3 = vld [vmem:[#allocation7 + $0x70] sm:$0xff]  ;;  %v143_v4 = vld [vmem:[#allocation5 + $0x68] sm:$0xff]  ;;  %vm545_vm1 = vcmask 64512   ;;  %s1722_s24 = smov [#allocation14]  }
  0x55   :  { %1291 = vmatprep.subr.mxu1 %v236_v1  ;;  %1257 = vmatpush3.msra.mxu0 %v145_v0  ;;  %v234_v5 = vld [vmem:[#allocation7 + $0x68] sm:$0xff]  ;;  %v142_v6 = vld [vmem:[#allocation5 + $0x60] sm:$0xff]  ;;  %v141_v8 = vld [vmem:[#allocation5 + $0x58] sm:$0xff]  ;;  %s1103_s1 = sshll.u32 %s1722_s24, 4  ;;  %s1104_s1 = int_to_ptr.vmem [resolvable:$true] %s1103_s1 }
  0x56   :  { %1292 = vmatpush3.msra.mxu1 %v236_v1  ;;  %1258 = vmatprep.subr.mxu0 %v144_v2  ;;  %v233_v7 = vld [vmem:[#allocation7 + $0x60] sm:$0xff]  ;;  %v232_v9 = vld [vmem:[#allocation7 + $0x58] sm:$0xff]  ;;  %v140_v10 = vld [vmem:[#allocation5 + $0x50] sm:$0xff]  ;;  %p1686_p8 = scmp.lt.s32.totalorder %s1104_s1, %s1104_s1 }
  0x57   :  { %1293 = vmatprep.subr.mxu1 %v235_v3  ;;  %1259 = vmatpush3.msra.mxu0 %v144_v2  ;;  %v231_v11 = vld [vmem:[#allocation7 + $0x50] sm:$0xff]  ;;  %v139_v12 = vld [vmem:[#allocation5 + $0x48] sm:$0xff]  ;;  %v138_v14 = vld [vmem:[#allocation5 + $0x40] sm:$0xff] }
  0x58   :  { %1294 = vmatpush3.msra.mxu1 %v235_v3  ;;  %1260 = vmatprep.subr.mxu0 %v143_v4  ;;  %v230_v13 = vld [vmem:[#allocation7 + $0x48] sm:$0xff]  ;;  %v229_v15 = vld [vmem:[#allocation7 + $0x40] sm:$0xff]  ;;  %v137_v16 = vld [vmem:[#allocation5 + $0x38] sm:$0xff] }
  0x59   :  { %1295 = vmatprep.subr.mxu1 %v234_v5  ;;  %1261 = vmatpush3.msra.mxu0 %v143_v4  ;;  %v228_v17 = vld [vmem:[#allocation7 + $0x38] sm:$0xff]  ;;  %v136_v18 = vld [vmem:[#allocation5 + $0x30] sm:$0xff]  ;;  %v135_v20 = vld [vmem:[#allocation5 + $0x28] sm:$0xff] }
  0x5a   :  { %1296 = vmatpush3.msra.mxu1 %v234_v5  ;;  %1262 = vmatprep.subr.mxu0 %v142_v6  ;;  %v227_v19 = vld [vmem:[#allocation7 + $0x30] sm:$0xff]  ;;  %v226_v21 = vld [vmem:[#allocation7 + $0x28] sm:$0xff]  ;;  %v134_v22 = vld [vmem:[#allocation5 + $0x20] sm:$0xff] }
  0x5b   :  { %1297 = vmatprep.subr.mxu1 %v233_v7  ;;  %1263 = vmatpush3.msra.mxu0 %v142_v6  ;;  %v225_v23 = vld [vmem:[#allocation7 + $0x20] sm:$0xff]  ;;  %v133_v24 = vld [vmem:[#allocation5 + $0x18] sm:$0xff]  ;;  %v132_v26 = vld [vmem:[#allocation5 + $0x10] sm:$0xff] }
  0x5c   :  { %1298 = vmatpush3.msra.mxu1 %v233_v7  ;;  %1264 = vmatprep.subr.mxu0 %v141_v8  ;;  %v224_v25 = vld [vmem:[#allocation7 + $0x18] sm:$0xff]  ;;  %v223_v27 = vld [vmem:[#allocation7 + $0x10] sm:$0xff]  ;;  %v131_v28 = vld [vmem:[#allocation5 + $0x8] sm:$0xff] }
  0x5d   :  { %1299 = vmatprep.subr.mxu1 %v232_v9  ;;  %1265 = vmatpush3.msra.mxu0 %v141_v8  ;;  %v222_v29 = vld [vmem:[#allocation7 + $0x8] sm:$0xff]  ;;  %v130_v30 = vld [vmem:[#allocation5] sm:$0xff]  ;;  %v1815_v32 = vld [vmem:[#allocation2] sm:$0xff] }
  0x5e   :  { %1300 = vmatpush3.msra.mxu1 %v232_v9  ;;  %1266 = vmatprep.subr.mxu0 %v140_v10  ;;  %v221_v31 = vld [vmem:[#allocation7] sm:$0xff]  ;;  %v1817_v33 = vld [vmem:[#allocation2 + $0x8] sm:$0xff]  ;;  %v326_v42 = vld [vmem:[#allocation8 + $0x70] sm:$0xff] }
  0x5f   :  { %1301 = vmatprep.subr.mxu1 %v231_v11  ;;  %1267 = vmatpush3.msra.mxu0 %v140_v10  ;;  %v327_v41 = vld [vmem:[#allocation8 + $0x78] sm:$0xff]  ;;  %v325_v43 = vld [vmem:[#allocation8 + $0x68] sm:$0xff]  ;;  %v324_v44 = vld [vmem:[#allocation8 + $0x60] sm:$0xff] }
  0x60   :  { %1302 = vmatpush3.msra.mxu1 %v231_v11  ;;  %1268 = vmatprep.subr.mxu0 %v139_v12  ;;  %v323_v45 = vld [vmem:[#allocation8 + $0x58] sm:$0xff]  ;;  %v322_v46 = vld [vmem:[#allocation8 + $0x50] sm:$0xff]  ;;  %v321_v47 = vld [vmem:[#allocation8 + $0x48] sm:$0xff] }
  0x61   :  { %1303 = vmatprep.subr.mxu1 %v230_v13  ;;  %1269 = vmatpush3.msra.mxu0 %v139_v12  ;;  %v320_v48 = vld [vmem:[#allocation8 + $0x40] sm:$0xff]  ;;  %v319_v49 = vld [vmem:[#allocation8 + $0x38] sm:$0xff]  ;;  %v318_v50 = vld [vmem:[#allocation8 + $0x30] sm:$0xff] }
  0x62   :  { %1304 = vmatpush3.msra.mxu1 %v230_v13  ;;  %1270 = vmatprep.subr.mxu0 %v138_v14  ;;  %v317_v51 = vld [vmem:[#allocation8 + $0x28] sm:$0xff]  ;;  %v316_v52 = vld [vmem:[#allocation8 + $0x20] sm:$0xff]  ;;  %v315_v53 = vld [vmem:[#allocation8 + $0x18] sm:$0xff] }
  0x63   :  { %1305 = vmatprep.subr.mxu1 %v229_v15  ;;  %1271 = vmatpush3.msra.mxu0 %v138_v14  ;;  %v314_v54 = vld [vmem:[#allocation8 + $0x10] sm:$0xff]  ;;  %v313_v55 = vld [vmem:[#allocation8 + $0x8] sm:$0xff]  ;;  %v312_v56 = vld [vmem:[#allocation8] sm:$0xff] }
  0x64   :  { %1306 = vmatpush3.msra.mxu1 %v229_v15  ;;  %1272 = vmatprep.subr.mxu0 %v137_v16  ;;  %v729_v15 = vld [vmem:[#allocation10 + $0x78] sm:$0xff] }
  0x65   :  { %1307 = vmatprep.subr.mxu1 %v228_v17  ;;  %1273 = vmatpush3.msra.mxu0 %v137_v16 }
  0x66   :  { %1308 = vmatpush3.msra.mxu1 %v228_v17  ;;  %1274 = vmatprep.subr.mxu0 %v136_v18 }
  0x67   :  { %1309 = vmatprep.subr.mxu1 %v227_v19  ;;  %1275 = vmatpush3.msra.mxu0 %v136_v18  ;;  %v728_v18 = vld [vmem:[#allocation10 + $0x70] sm:$0xff] }
  0x68   :  { %1310 = vmatpush3.msra.mxu1 %v227_v19  ;;  %1276 = vmatprep.subr.mxu0 %v135_v20  ;;  %v727_v19 = vld [vmem:[#allocation10 + $0x68] sm:$0xff] }
  0x69   :  { %1311 = vmatprep.subr.mxu1 %v226_v21  ;;  %1277 = vmatpush3.msra.mxu0 %v135_v20  ;;  %v726_v20 = vld [vmem:[#allocation10 + $0x60] sm:$0xff] }
  0x6a   :  { %1312 = vmatpush3.msra.mxu1 %v226_v21  ;;  %1278 = vmatprep.subr.mxu0 %v134_v22  ;;  %v725_v21 = vld [vmem:[#allocation10 + $0x58] sm:$0xff] }
  0x6b   :  { %1313 = vmatprep.subr.mxu1 %v225_v23  ;;  %1279 = vmatpush3.msra.mxu0 %v134_v22  ;;  %v724_v22 = vld [vmem:[#allocation10 + $0x50] sm:$0xff] }
  0x6c   :  { %1314 = vmatpush3.msra.mxu1 %v225_v23  ;;  %1280 = vmatprep.subr.mxu0 %v133_v24  ;;  %v723_v23 = vld [vmem:[#allocation10 + $0x48] sm:$0xff] }
  0x6d   :  { %1315 = vmatprep.subr.mxu1 %v224_v25  ;;  %1281 = vmatpush3.msra.mxu0 %v133_v24  ;;  %v722_v24 = vld [vmem:[#allocation10 + $0x40] sm:$0xff] }
  0x6e   :  { %1316 = vmatpush3.msra.mxu1 %v224_v25  ;;  %1282 = vmatprep.subr.mxu0 %v132_v26  ;;  %v721_v25 = vld [vmem:[#allocation10 + $0x38] sm:$0xff] }
  0x6f   :  { %1317 = vmatprep.subr.mxu1 %v223_v27  ;;  %1283 = vmatpush3.msra.mxu0 %v132_v26  ;;  %v720_v26 = vld [vmem:[#allocation10 + $0x30] sm:$0xff] }
  0x70   :  { %1318 = vmatpush3.msra.mxu1 %v223_v27  ;;  %1284 = vmatprep.subr.mxu0 %v131_v28  ;;  %v719_v27 = vld [vmem:[#allocation10 + $0x28] sm:$0xff] }
  0x71   :  { %1319 = vmatprep.subr.mxu1 %v222_v29  ;;  %1285 = vmatpush3.msra.mxu0 %v131_v28  ;;  %v718_v28 = vld [vmem:[#allocation10 + $0x20] sm:$0xff] }
  0x72   :  { %1320 = vmatpush3.msra.mxu1 %v222_v29  ;;  %1286 = vmatprep.subr.mxu0 %v130_v30  ;;  %v717_v29 = vld [vmem:[#allocation10 + $0x18] sm:$0xff] }
  0x73   :  { %1321 = vmatprep.subr.mxu1 %v221_v31  ;;  %1287 = vmatpush3.msra.mxu0 %v130_v30  ;;  %v716_v30 = vld [vmem:[#allocation10 + $0x10] sm:$0xff] }
  0x74   :  { %1288 = vmatprep.mubr.f32.mxu0 %v1815_v32  ;;  %1322 = vmatpush3.msra.mxu1 %v221_v31  ;;  %v715_v31 = vld [vmem:[#allocation10 + $0x8] sm:$0xff] }
  0x75   :  { %1323 = vmatprep.mubr.f32.mxu1 %v1815_v32  ;;  %1289 = vmatmul.mubr.f32.vlgmr.msra.gmra.mxu0 %v1817_v33 }
  0x76   :  { %1324 = vmatmul.mubr.f32.vlgmr.msra.gmra.mxu1 %v1817_v33  ;;  %1358 = vmatprep.mubr.f32.mxu0 %v1815_v32 }
  0x77   :  { %1361 = vmatprep.subr.mxu1 %v1720_v34  ;;  %1363 = vmatprep.mubr.msk.f32.mxu1 %vm1721_vm0, %v1720_v34 }
  0x78   :  { %1326 = vmatprep.subr.mxu0 %v327_v41 }
  0x79   :  { %1327 = vmatpush3.msra.mxu0 %v327_v41  ;;  %v831_v41 = vld [vmem:[#allocation11 + $0xd0] sm:$0xff] }
  0x7a   :  { %1328 = vmatprep.subr.mxu0 %v326_v42 }
  0x7b   :  { %1329 = vmatpush3.msra.mxu0 %v326_v42  ;;  %v830_v42 = vld [vmem:[#allocation11 + $0xc8] sm:$0xff] }
  0x7c   :  { %1330 = vmatprep.subr.mxu0 %v325_v43 }
  0x7d   :  { %1331 = vmatpush3.msra.mxu0 %v325_v43  ;;  %v829_v43 = vld [vmem:[#allocation11 + $0xc0] sm:$0xff] }
  0x7e   :  { %1332 = vmatprep.subr.mxu0 %v324_v44 }
  0x7f   :  { %1333 = vmatpush3.msra.mxu0 %v324_v44  ;;  %v828_v44 = vld [vmem:[#allocation11 + $0xb8] sm:$0xff] }
  0x80   :  { %1334 = vmatprep.subr.mxu0 %v323_v45 }
  0x81   :  { %1335 = vmatpush3.msra.mxu0 %v323_v45  ;;  %v827_v45 = vld [vmem:[#allocation11 + $0xb0] sm:$0xff] }
  0x82   :  { %1336 = vmatprep.subr.mxu0 %v322_v46 }
  0x83   :  { %1337 = vmatpush3.msra.mxu0 %v322_v46  ;;  %v826_v46 = vld [vmem:[#allocation11 + $0xa8] sm:$0xff] }
  0x84   :  { %1338 = vmatprep.subr.mxu0 %v321_v47 }
  0x85   :  { %1339 = vmatpush3.msra.mxu0 %v321_v47  ;;  %v825_v47 = vld [vmem:[#allocation11 + $0xa0] sm:$0xff] }
  0x86   :  { %1340 = vmatprep.subr.mxu0 %v320_v48 }
  0x87   :  { %1341 = vmatpush3.msra.mxu0 %v320_v48  ;;  %v824_v48 = vld [vmem:[#allocation11 + $0x98] sm:$0xff] }
  0x88   :  { %1342 = vmatprep.subr.mxu0 %v319_v49 }
  0x89   :  { %1343 = vmatpush3.msra.mxu0 %v319_v49  ;;  %v823_v49 = vld [vmem:[#allocation11 + $0x90] sm:$0xff] }
  0x8a   :  { %1344 = vmatprep.subr.mxu0 %v318_v50 }
  0x8b   :  { %1345 = vmatpush3.msra.mxu0 %v318_v50 }
  0x8c   :  { %1346 = vmatprep.subr.mxu0 %v317_v51 }
  0x8d   :  { %1347 = vmatpush3.msra.mxu0 %v317_v51 }
  0x8e   :  { %1348 = vmatprep.subr.mxu0 %v316_v52 }
  0x8f   :  { %1349 = vmatpush3.msra.mxu0 %v316_v52 }
  0x90   :  { %1350 = vmatprep.subr.mxu0 %v315_v53 }
  0x91   :  { %1351 = vmatpush3.msra.mxu0 %v315_v53  ;;  %v819_v53 = vld [vmem:[#allocation11 + $0x70] sm:$0xff] }
  0x92   :  { %1352 = vmatprep.subr.mxu0 %v314_v54 }
  0x93   :  { %1353 = vmatpush3.msra.mxu0 %v314_v54 }
  0x94   :  { %1354 = vmatprep.subr.mxu0 %v313_v55 }
  0x95   :  { %1355 = vmatpush3.msra.mxu0 %v313_v55  ;;  %v818_v55 = vld [vmem:[#allocation11 + $0x68] sm:$0xff] }
  0x96   :  { %1356 = vmatprep.subr.mxu0 %v312_v56 }
  0x97   :  { %1357 = vmatpush3.msra.mxu0 %v312_v56  ;;  %v817_v56 = vld [vmem:[#allocation11 + $0x60] sm:$0xff] }
  0x98   :  { %1359 = vmatmul.mubr.f32.vlgmr.msra.gmra.mxu0 %v1817_v33 }
 0x135   :  { %v1290_v35 = vpop.f32.mrf.mxu0 }
 0x136   :  { %v1325_v36 = vpop.f32.mrf.mxu1  ;;  %v404_v40 = vmul.f32 0.088388346, %v1290_v35  ;;  %v820_v35 = vld [vmem:[#allocation11 + $0x78] sm:$0xff] }
 0x137   :  { %v212_v37 = vpop.f32.mrf.mxu0 }
 0x138   :  { %v303_v38 = vpop.f32.mrf.mxu1  ;;  %v403_v39 = vmul.f32 0.088388346, %v212_v37  ;;  %v835_v37 = vld [vmem:[#allocation11 + $0xf0] sm:$0xff] }
 0x139   :  { %1362 = vmatpush3.xpose.msra.mxu1 %v303_v38  ;;  %v834_v38 = vld [vmem:[#allocation11 + $0xe8] sm:$0xff] }
 0x13a   :  { %1366 = vmatprep.subr.mxu1 %v1720_v34 }
 0x13c   :  { %1364 = vmatmul.mubr.f32.vlgmr.msra.gmra.mxu1 %v403_v39  ;;  %v833_v39 = vld [vmem:[#allocation11 + $0xe0] sm:$0xff] }
 0x13d   :  { %1367 = vmatpush3.xpose.msra.mxu1 %v1325_v36  ;;  %1368 = vmatprep.mubr.msk.f32.mxu1 %vm1721_vm0, %v1720_v34  ;;  %v836_v36 = vld [vmem:[#allocation11 + $0xf8] sm:$0xff] }
 0x13e   :  { %1371 = vmatprep.subr.mxu1 %v1720_v34  ;;  %1416 = vmatprep.subr.mxu0 %v836_v36 }
 0x13f   :  { %1417 = vmatpush3.msra.mxu0 %v836_v36  ;;  %v1121_v36 = vld [vmem:[%s1865_s8] ss:$0 sm:$0xff] }
 0x140   :  { %1369 = vmatmul.mubr.f32.vlgmr.msra.gmra.mxu1 %v404_v40  ;;  %1418 = vmatprep.subr.mxu0 %v835_v37  ;;  %v832_v40 = vld [vmem:[#allocation11 + $0xd8] sm:$0xff] }
 0x141   :  { %1373 = vmatprep.mubr.msk.f32.mxu1 %vm1721_vm0, %v1720_v34  ;;  %1419 = vmatpush3.msra.mxu0 %v835_v37 }
 0x142   :  { %1420 = vmatprep.subr.mxu0 %v834_v38 }
 0x143   :  { %1421 = vmatpush3.msra.mxu0 %v834_v38 }
 0x144   :  { %1422 = vmatprep.subr.mxu0 %v833_v39 }
 0x145   :  { %1423 = vmatpush3.msra.mxu0 %v833_v39 }
 0x146   :  { %1424 = vmatprep.subr.mxu0 %v832_v40 }
 0x147   :  { %1425 = vmatpush3.msra.mxu0 %v832_v40 }
 0x148   :  { %1426 = vmatprep.subr.mxu0 %v831_v41 }
 0x149   :  { %1427 = vmatpush3.msra.mxu0 %v831_v41 }
 0x14a   :  { %1428 = vmatprep.subr.mxu0 %v830_v42 }
 0x14b   :  { %1429 = vmatpush3.msra.mxu0 %v830_v42 }
 0x14c   :  { %1430 = vmatprep.subr.mxu0 %v829_v43 }
 0x14d   :  { %1431 = vmatpush3.msra.mxu0 %v829_v43 }
 0x14e   :  { %1432 = vmatprep.subr.mxu0 %v828_v44 }
 0x14f   :  { %1433 = vmatpush3.msra.mxu0 %v828_v44 }
 0x150   :  { %1434 = vmatprep.subr.mxu0 %v827_v45 }
 0x151   :  { %1435 = vmatpush3.msra.mxu0 %v827_v45 }
 0x152   :  { %1436 = vmatprep.subr.mxu0 %v826_v46 }
 0x153   :  { %1437 = vmatpush3.msra.mxu0 %v826_v46 }
 0x154   :  { %1438 = vmatprep.subr.mxu0 %v825_v47 }
 0x155   :  { %1439 = vmatpush3.msra.mxu0 %v825_v47 }
 0x156   :  { %1440 = vmatprep.subr.mxu0 %v824_v48 }
 0x157   :  { %1441 = vmatpush3.msra.mxu0 %v824_v48 }
 0x158   :  { %v1360_v9 = vpop.f32.mrf.mxu0  ;;  %1442 = vmatprep.subr.mxu0 %v823_v49 }
 0x159   :  { %1443 = vmatpush3.msra.mxu0 %v823_v49 }
 0x15a   :  { %v394_v10 = vpop.f32.mrf.mxu0 }
 0x15b   :  { %1372 = vmatpush3.msra.mxu1 %v394_v10  ;;  %v1011_v10 = vld [vmem:[#allocation13 + $0x68] sm:$0xff] }
 0x15c   :  { %1376 = vmatprep.subr.mxu1 %v1720_v34 }
 0x1fc   :  { %v471_v57 = vpop.f32.mrf.mxu1 }
 0x1fd   :  { %v546_v58 = vsel %vm545_vm1, %v471_v57, -inf }
 0x1fe   :  { %547 = vmax.xlane.f32.xlu0 %v546_v58  ;;  %v1365_v59 = vpop.f32.mrf.mxu1  ;;  %v815_v58 = vld [vmem:[#allocation11 + $0x50] sm:$0xff] }
 0x1ff   :  { %v814_v59 = vld [vmem:[#allocation11 + $0x48] sm:$0xff] }
 0x200   :  { %v541_v60 = vpop.f32.mrf.mxu1 }
 0x201   :  { %v549_v61 = vsel %vm545_vm1, %v541_v60, -inf }
 0x202   :  { %550 = vmax.xlane.f32.xlu0 %v549_v61  ;;  %v1370_v62 = vpop.f32.mrf.mxu1  ;;  %v812_v61 = vld [vmem:[#allocation11 + $0x38] sm:$0xff] }
 0x203   :  { %v810_v62 = vld [vmem:[#allocation11 + $0x28] sm:$0xff] }
 0x287   :  { %v548_v63 = vpop.xlane.xlu0 %547 }
 0x288   :  { %v552_v0 = vsub.f32 %v471_v57, %v548_v63  ;;  %v816_v57 = vld [vmem:[#allocation11 + $0x58] sm:$0xff]  ;;  %v809_v63 = vld [vmem:[#allocation11 + $0x20] sm:$0xff] }
 0x28a   :  { %v554_v1 = vmul.f32 1.442695, %v552_v0  ;;  %v808_v0 = vld [vmem:[#allocation11 + $0x18] sm:$0xff] }
 0x28b   :  { %v551_v2 = vpop.xlane.xlu0 %550 }
 0x28c   :  { %1533 = vpow2.f32 %v554_v1  ;;  %v553_v3 = vsub.f32 %v541_v60, %v551_v2  ;;  %v813_v60 = vld [vmem:[#allocation11 + $0x40] sm:$0xff]  ;;  %v807_v1 = vld [vmem:[#allocation11 + $0x10] sm:$0xff]  ;;  %v806_v2 = vld [vmem:[#allocation11 + $0x8] sm:$0xff] }
 0x28e   :  { %v556_v4 = vmul.f32 1.442695, %v553_v3  ;;  %v822_v3 = vld [vmem:[#allocation11 + $0x88] sm:$0xff] }
 0x28f   :  { %1444 = vmatprep.subr.mxu0 %v822_v3 }
 0x290   :  { %1535 = vpow2.f32 %v556_v4  ;;  %v805_v4 = vld [vmem:[#allocation11] sm:$0xff]  ;;  %1445 = vmatpush3.msra.mxu0 %v822_v3 }
 0x299   :  { %v1534_v5 = vpop.eup %1533 }
 0x29a   :  { %v558_v6 = vsel %vm545_vm1, %v1534_v5, 0.0 }
 0x29b   :  { %559 = vadd.xlane.f32.xlu1 %v558_v6  ;;  %v1013_v6 = vld [vmem:[#allocation13 + $0x78] sm:$0xff] }
 0x29d   :  { %v1536_v7 = vpop.eup %1535 }
 0x29e   :  { %v561_v8 = vsel %vm545_vm1, %v1536_v7, 0.0 }
 0x29f   :  { %562 = vadd.xlane.f32.xlu1 %v561_v8 }
 0x324   :  { %v560_v11 = vpop.xlane.xlu1 %559 }
 0x325   :  { %1537 = vrcp.f32 %v560_v11  ;;  %v1010_v11 = vld [vmem:[#allocation13 + $0x60] sm:$0xff] }
 0x328   :  { %v563_v12 = vpop.xlane.xlu1 %562 }
 0x329   :  { %1539 = vrcp.f32 %v563_v12  ;;  %v1009_v12 = vld [vmem:[#allocation13 + $0x58] sm:$0xff] }
 0x332   :  { %v1538_v13 = vpop.eup %1537 }
 0x333   :  { %v566_v14 = vmul.f32 %v1538_v13, %v1534_v5  ;;  %v821_v5 = vld [vmem:[#allocation11 + $0x80] sm:$0xff]  ;;  %v1008_v13 = vld [vmem:[#allocation13 + $0x50] sm:$0xff] }
 0x334   :  { %1446 = vmatprep.subr.mxu0 %v821_v5 }
 0x335   :  { %1374 = vmatmul.mubr.msk.f32.vlgmr.msra.gmra.mxu1 %vm545_vm1, %v566_v14  ;;  %1447 = vmatpush3.msra.mxu0 %v821_v5  ;;  %v1006_v14 = vld [vmem:[#allocation13 + $0x40] sm:$0xff] }
 0x336   :  { %v1540_v16 = vpop.eup %1539  ;;  %1377 = vmatpush3.msra.mxu1 %v1360_v9  ;;  %1378 = vmatprep.mubr.msk.f32.mxu1 %vm1721_vm0, %v1720_v34  ;;  %v714_v34 = vld [vmem:[#allocation10] sm:$0xff]  ;;  %v1012_v9 = vld [vmem:[#allocation13 + $0x70] sm:$0xff] }
 0x337   :  { %v567_v17 = vmul.f32 %v1540_v16, %v1536_v7  ;;  %1381 = vmatprep.subr.mxu1 %v729_v15  ;;  %1486 = vmatprep.subr.mxu0 %v1013_v6  ;;  %v1004_v16 = vld [vmem:[#allocation13 + $0x30] sm:$0xff] }
 0x339   :  { %1379 = vmatmul.mubr.msk.f32.vlgmr.msra.gmra.mxu1 %vm545_vm1, %v567_v17  ;;  %v1003_v17 = vld [vmem:[#allocation13 + $0x28] sm:$0xff] }
 0x33a   :  { %1382 = vmatpush3.msra.mxu1 %v729_v15  ;;  %v1005_v15 = vld [vmem:[#allocation13 + $0x38] sm:$0xff] }
 0x33b   :  { %1383 = vmatprep.subr.mxu1 %v728_v18 }
 0x33c   :  { %1384 = vmatpush3.msra.mxu1 %v728_v18  ;;  %v1002_v18 = vld [vmem:[#allocation13 + $0x20] sm:$0xff] }
 0x33d   :  { %1385 = vmatprep.subr.mxu1 %v727_v19 }
 0x33e   :  { %1386 = vmatpush3.msra.mxu1 %v727_v19  ;;  %v1001_v19 = vld [vmem:[#allocation13 + $0x18] sm:$0xff] }
 0x33f   :  { %1387 = vmatprep.subr.mxu1 %v726_v20 }
 0x340   :  { %1388 = vmatpush3.msra.mxu1 %v726_v20  ;;  %v1000_v20 = vld [vmem:[#allocation13 + $0x10] sm:$0xff] }
 0x341   :  { %1389 = vmatprep.subr.mxu1 %v725_v21 }
 0x342   :  { %1390 = vmatpush3.msra.mxu1 %v725_v21  ;;  %v999_v21 = vld [vmem:[#allocation13 + $0x8] sm:$0xff] }
 0x343   :  { %1391 = vmatprep.subr.mxu1 %v724_v22 }
 0x344   :  { %1392 = vmatpush3.msra.mxu1 %v724_v22  ;;  %v998_v22 = vld [vmem:[#allocation13] sm:$0xff] }
 0x345   :  { %1393 = vmatprep.subr.mxu1 %v723_v23 }
 0x346   :  { %1394 = vmatpush3.msra.mxu1 %v723_v23 }
 0x347   :  { %1395 = vmatprep.subr.mxu1 %v722_v24 }
 0x348   :  { %1396 = vmatpush3.msra.mxu1 %v722_v24 }
 0x349   :  { %1397 = vmatprep.subr.mxu1 %v721_v25 }
 0x34a   :  { %1398 = vmatpush3.msra.mxu1 %v721_v25 }
 0x34b   :  { %1399 = vmatprep.subr.mxu1 %v720_v26 }
 0x34c   :  { %1400 = vmatpush3.msra.mxu1 %v720_v26  ;;  %v1120_v26 = vld [vmem:[%s1863_s6] ss:$0 sm:$0xff]  ;;  %s1681_s6 = scalar_lea.vmem %s1104_s1, 256 }
 0x34d   :  { %1401 = vmatprep.subr.mxu1 %v719_v27  ;;  %p1682_p7 = scmp.ne.s32.totalorder %s1104_s1, %s1681_s6  ;;  %p1687_p9 = scmp.lt.s32.totalorder %s1681_s6, %s1681_s6 }
 0x34e   :  { %1402 = vmatpush3.msra.mxu1 %v719_v27 }
 0x34f   :  { %1403 = vmatprep.subr.mxu1 %v718_v28  ;;  %p1688_p10 = por %p1687_p9, %p1686_p8 }
 0x350   :  { %1404 = vmatpush3.msra.mxu1 %v718_v28 }
 0x351   :  { %1405 = vmatprep.subr.mxu1 %v717_v29  ;;  %p1689_p11 = pnand %p1688_p10, %p1682_p7 }
 0x352   :  { %1406 = vmatpush3.msra.mxu1 %v717_v29 }
 0x353   :  { %1407 = vmatprep.subr.mxu1 %v716_v30 }
 0x354   :  { %1408 = vmatpush3.msra.mxu1 %v716_v30 }
 0x355   :  { %1409 = vmatprep.subr.mxu1 %v715_v31 }
 0x356   :  { %1410 = vmatpush3.msra.mxu1 %v715_v31 }
 0x357   :  { %1411 = vmatprep.subr.mxu1 %v714_v34 }
 0x358   :  { %1412 = vmatpush3.msra.mxu1 %v714_v34 }
 0x359   :  { %1451 = vmatprep.subr.mxu1 %v820_v35 }
 0x3f5   :  { %v637_v50 = vpop.f32.mrf.mxu1 }
 0x3f6   :  { %1413 = vmatprep.mubr.f32.mxu1 %v637_v50 }
 0x3f7   :  { %v1375_v51 = vpop.f32.mrf.mxu1 }
 0x3f9   :  { %v710_v52 = vpop.f32.mrf.mxu1 }
 0x3fa   :  { %1414 = vmatmul.mubr.f32.vlgmr.msra.gmra.mxu1 %v710_v52 }
 0x3fb   :  { %v1380_v54 = vpop.f32.mrf.mxu1  ;;  %1452 = vmatpush3.msra.mxu1 %v820_v35  ;;  %1483 = vmatprep.mubr.f32.mxu1 %v1815_v32  ;;  %v811_v32 = vld [vmem:[#allocation11 + $0x30] sm:$0xff] }
 0x3fc   :  { %1453 = vmatprep.subr.mxu1 %v819_v53 }
 0x3fd   :  { %1454 = vmatpush3.msra.mxu1 %v819_v53 }
 0x3fe   :  { %1455 = vmatprep.subr.mxu1 %v818_v55 }
 0x3ff   :  { %1456 = vmatpush3.msra.mxu1 %v818_v55 }
 0x400   :  { %1457 = vmatprep.subr.mxu1 %v817_v56 }
 0x401   :  { %1458 = vmatpush3.msra.mxu1 %v817_v56 }
 0x402   :  { %1459 = vmatprep.subr.mxu1 %v816_v57 }
 0x403   :  { %1460 = vmatpush3.msra.mxu1 %v816_v57 }
 0x404   :  { %1461 = vmatprep.subr.mxu1 %v815_v58 }
 0x405   :  { %1462 = vmatpush3.msra.mxu1 %v815_v58 }
 0x406   :  { %1463 = vmatprep.subr.mxu1 %v814_v59 }
 0x407   :  { %1464 = vmatpush3.msra.mxu1 %v814_v59 }
 0x408   :  { %1465 = vmatprep.subr.mxu1 %v813_v60 }
 0x409   :  { %1466 = vmatpush3.msra.mxu1 %v813_v60 }
 0x40a   :  { %1467 = vmatprep.subr.mxu1 %v812_v61 }
 0x40b   :  { %1468 = vmatpush3.msra.mxu1 %v812_v61 }
 0x40c   :  { %1469 = vmatprep.subr.mxu1 %v811_v32 }
 0x40d   :  { %1470 = vmatpush3.msra.mxu1 %v811_v32 }
 0x40e   :  { %1471 = vmatprep.subr.mxu1 %v810_v62 }
 0x40f   :  { %1472 = vmatpush3.msra.mxu1 %v810_v62 }
 0x410   :  { %1473 = vmatprep.subr.mxu1 %v809_v63 }
 0x411   :  { %1474 = vmatpush3.msra.mxu1 %v809_v63 }
 0x412   :  { %1475 = vmatprep.subr.mxu1 %v808_v0 }
 0x413   :  { %1476 = vmatpush3.msra.mxu1 %v808_v0 }
 0x414   :  { %1477 = vmatprep.subr.mxu1 %v807_v1 }
 0x415   :  { %1478 = vmatpush3.msra.mxu1 %v807_v1 }
 0x416   :  { %1479 = vmatprep.subr.mxu1 %v806_v2 }
 0x417   :  { %1480 = vmatpush3.msra.mxu1 %v806_v2 }
 0x418   :  { %1481 = vmatprep.subr.mxu1 %v805_v4 }
 0x419   :  { %1482 = vmatpush3.msra.mxu1 %v805_v4 }
 0x41a   :  { %1484 = vmatmul.mubr.f32.vlgmr.msra.gmra.mxu1 %v1817_v33  ;;  %v1007_v33 = vld [vmem:[#allocation13 + $0x48] sm:$0xff] }
 0x4ba   :  { %v1415_v7 = vpop.f32.mrf.mxu1 }
 0x4bc   :  { %v796_v8 = vpop.f32.mrf.mxu1 }
 0x4bd   :  { %1448 = vmatprep.mubr.f32.mxu0 %v796_v8 }
 0x4be   :  { %1449 = vmatmul.mubr.f32.vlgmr.msra.gmra.mxu0 %v1415_v7 }
 0x4bf   :  { %1487 = vmatpush3.msra.mxu0 %v1013_v6 }
 0x4c0   :  { %1488 = vmatprep.subr.mxu0 %v1012_v9 }
 0x4c1   :  { %1489 = vmatpush3.msra.mxu0 %v1012_v9 }
 0x4c2   :  { %1490 = vmatprep.subr.mxu0 %v1011_v10 }
 0x4c3   :  { %1491 = vmatpush3.msra.mxu0 %v1011_v10 }
 0x4c4   :  { %1492 = vmatprep.subr.mxu0 %v1010_v11 }
 0x4c5   :  { %1493 = vmatpush3.msra.mxu0 %v1010_v11 }
 0x4c6   :  { %1494 = vmatprep.subr.mxu0 %v1009_v12 }
 0x4c7   :  { %1495 = vmatpush3.msra.mxu0 %v1009_v12 }
 0x4c8   :  { %1496 = vmatprep.subr.mxu0 %v1008_v13 }
 0x4c9   :  { %1497 = vmatpush3.msra.mxu0 %v1008_v13 }
 0x4ca   :  { %1498 = vmatprep.subr.mxu0 %v1007_v33 }
 0x4cb   :  { %1499 = vmatpush3.msra.mxu0 %v1007_v33 }
 0x4cc   :  { %1500 = vmatprep.subr.mxu0 %v1006_v14 }
 0x4cd   :  { %1501 = vmatpush3.msra.mxu0 %v1006_v14 }
 0x4ce   :  { %1502 = vmatprep.subr.mxu0 %v1005_v15 }
 0x4cf   :  { %1503 = vmatpush3.msra.mxu0 %v1005_v15 }
 0x4d0   :  { %1504 = vmatprep.subr.mxu0 %v1004_v16 }
 0x4d1   :  { %1505 = vmatpush3.msra.mxu0 %v1004_v16 }
 0x4d2   :  { %1506 = vmatprep.subr.mxu0 %v1003_v17 }
 0x4d3   :  { %1507 = vmatpush3.msra.mxu0 %v1003_v17 }
 0x4d4   :  { %1508 = vmatprep.subr.mxu0 %v1002_v18 }
 0x4d5   :  { %1509 = vmatpush3.msra.mxu0 %v1002_v18 }
 0x4d6   :  { %1510 = vmatprep.subr.mxu0 %v1001_v19 }
 0x4d7   :  { %1511 = vmatpush3.msra.mxu0 %v1001_v19 }
 0x4d8   :  { %1512 = vmatprep.subr.mxu0 %v1000_v20 }
 0x4d9   :  { %1513 = vmatpush3.msra.mxu0 %v1000_v20 }
 0x4da   :  { %1514 = vmatprep.subr.mxu0 %v999_v21  ;;  %v1485_v23 = vpop.f32.mrf.mxu1 }
 0x4db   :  { %1515 = vmatpush3.msra.mxu0 %v999_v21 }
 0x4dc   :  { %1516 = vmatprep.subr.mxu0 %v998_v22  ;;  %v978_v27 = vpop.f32.mrf.mxu1 }
 0x4dd   :  { %1517 = vmatpush3.msra.mxu0 %v998_v22 }
 0x57e   :  { %v1450_v24 = vpop.f32.mrf.mxu0 }
 0x57f   :  { %v984_v25 = vadd.f32 %v1485_v23, %v1450_v24 }
 0x580   :  { %v903_v28 = vpop.f32.mrf.mxu0 }
 0x581   :  { %v979_v29 = vadd.f32 %v978_v27, %v903_v28  ;;  %v995_v30 = vadd.f32 %v1120_v26, %v984_v25 }
 0x583   :  { %v994_v31 = vadd.f32 %v1120_v26, %v979_v29  ;;  %v997_v35 = vmax.f32 %v995_v30, 0.0 }
 0x585   :  { %v996_v34 = vmax.f32 %v994_v31, 0.0 }
 0x587   :  { %1518 = vmatprep.mubr.f32.mxu0 %v996_v34 }
 0x588   :  { %1519 = vmatmul.mubr.f32.vlgmr.msra.gmra.mxu0 %v997_v35 }
 0x648   :  { %v1520_v37 = vpop.f32.mrf.mxu0 }
 0x649   :  { %v1093_v38 = vadd.f32 %v1520_v37, %v1121_v36 }
 0x64a   :  { %v1087_v39 = vpop.f32.mrf.mxu0 }
 0x64b   :  { %1097 = vst [vmem:[#allocation14 + $0x8] sm:$0xff] %v1093_v38  ;;  %v1088_v40 = vadd.f32 %v1121_v36, %v1087_v39 }
 0x64d   :  { %1096 = vst [vmem:[#allocation14] sm:$0xff] %v1088_v40 }
 0x64e   :  { %1692 = shalt.err (!%p1689_p11)
}
 0x64f   :  { %1109 = dma.vmem_to_hbm [thread:$0]  %s1104_s1, 256, %s1866_s9, [#allocation4], %s1713_s14, %s1713_s14, %s1714_s15  }
 0x650   :  { %1709 = dma.done.wait [#allocation4], 256  }
 0x651   :  { %1710 = vsyncadd [#allocation4], 4294967040 }
 0x652   :  { %1113 = vsyncpa [#allocation3], 1 }
 0x653   :  { %1114 = vsyncpa [#allocation6], 1 }
 0x654   :  { %1115 = vsyncpa [#allocation9], 1 }
 0x655   :  { %1116 = vsyncpa [#allocation12], 1 }
 0x656   :  { %1117 = vsyncpa [#allocation4], 1 }

</bundles_post_ra>
